<compile_context>
chip_gen: v6e
topology: v6e:2x2x1
jax: 0.10.0
libtpu: 0.0.40
codegen_flags: <defaults>
</compile_context>

<pallas_src>
import functools

import jax
import jax.numpy as jnp
from jax.experimental import pallas as pl
from jax.experimental.pallas import tpu as pltpu

_EPS = 1e-5


def _layernorm_kernel(x_ref, w_ref, b_ref, o_ref):
    """Plain path: one logical row per slab row (C maps directly to lanes)."""
    x = x_ref[...].astype(jnp.float32)                    # (TM, C)
    mu = jnp.mean(x, axis=-1, keepdims=True)
    diff = x - mu
    var = jnp.mean(diff * diff, axis=-1, keepdims=True)   # biased (unbiased=False)
    inv = jax.lax.rsqrt(var + _EPS)
    o_ref[...] = (diff * inv * w_ref[...] + b_ref[...]).astype(o_ref.dtype)


def _layernorm_packed_kernel(x_ref, w_ref, b_ref, seg_ref, o_ref, *, c):
    """Lane-packed path: G = 128 // c logical rows folded into one 128-lane row.

    seg_ref is a (128,128) block-diagonal ones matrix; x @ seg computes the
    per-segment sum broadcast back over that segment (MXU -> free here).
    Two-pass (mean, then centered variance) to avoid E[x^2]-mu^2 cancellation.
    """
    x = x_ref[...].astype(jnp.float32)                    # (TM, 128)
    seg = seg_ref[...]                                    # (128, 128) f32
    inv_c = 1.0 / c
    mu = jnp.dot(x, seg, preferred_element_type=jnp.float32,
                 precision=jax.lax.Precision.HIGHEST) * inv_c
    diff = x - mu
    var = jnp.dot(diff * diff, seg, preferred_element_type=jnp.float32,
                  precision=jax.lax.Precision.HIGHEST) * inv_c
    inv = jax.lax.rsqrt(var + _EPS)
    o_ref[...] = (diff * inv * w_ref[...] + b_ref[...]).astype(o_ref.dtype)


def _choose_row_tile(rows, lane_width):
    """Largest row tile under a ~8 MiB double-buffered footprint, with >= 2
    grid steps when possible so v7x's two TensorCores both get work."""
    if rows <= 8:
        return rows                                   # block == full array dims
    budget_bytes = 8 * 1024 * 1024                    # 2 in-bufs + 2 out-bufs, f32
    per_row_bytes = 4 * lane_width * 4
    tm = budget_bytes // per_row_bytes
    half = -(-rows // 2)                              # cdiv(rows, 2)
    half = -(-half // 8) * 8                          # round up to sublane multiple
    tm = min(tm, 1024, half)
    tm = max(8, (tm // 8) * 8)
    return tm


def withbias_layernorm(x, weight, bias):
    """LayerNorm over the last dim of x, with learnable scale + bias (eps=1e-5)."""
    orig_shape = x.shape
    C = int(orig_shape[-1])
    N = 1
    for d in orig_shape[:-1]:
        N *= int(d)
    assert weight.shape == (C,) and bias.shape == (C,)

    x2d = x.reshape(N, C)
    w32 = weight.astype(jnp.float32)
    b32 = bias.astype(jnp.float32)

    use_packed = (C < 128) and (128 % C == 0) and N > 0 and (N % (128 // C) == 0)

    if use_packed:
        G = 128 // C
        L = 128
        rows = N // G
        x_in = x2d.reshape(rows, L)
        w_in = jnp.tile(w32, G).reshape(1, L)
        b_in = jnp.tile(b32, G).reshape(1, L)
        lane = jnp.arange(L, dtype=jnp.int32)
        seg = (lane[:, None] // C == lane[None, :] // C).astype(jnp.float32)
        kernel = functools.partial(_layernorm_packed_kernel, c=C)
        extra_inputs = (seg,)
        extra_specs = [pl.BlockSpec((L, L), lambda i: (0, 0))]
    else:
        L = C
        rows = N
        x_in = x2d
        w_in = w32.reshape(1, C)
        b_in = b32.reshape(1, C)
        kernel = _layernorm_kernel
        extra_inputs = ()
        extra_specs = []

    tm = _choose_row_tile(rows, L)
    grid = (pl.cdiv(rows, tm),)

    out = pl.pallas_call(
        kernel,
        out_shape=jax.ShapeDtypeStruct((rows, L), x.dtype),
        grid_spec=pltpu.PrefetchScalarGridSpec(
            num_scalar_prefetch=0,
            grid=grid,
            in_specs=[
                pl.BlockSpec((tm, L), lambda i: (i, 0)),
                pl.BlockSpec((1, L), lambda i: (0, 0)),
                pl.BlockSpec((1, L), lambda i: (0, 0)),
            ] + extra_specs,
            out_specs=pl.BlockSpec((tm, L), lambda i: (i, 0)),
        ),
        compiler_params=pltpu.CompilerParams(
            dimension_semantics=("parallel",),
            vmem_limit_bytes=32 * 1024 * 1024,
        ),
    )(x_in, w_in, b_in, *extra_inputs)

    return out.reshape(orig_shape)


def _reference(x, weight, bias):
    mu = jnp.mean(x, axis=-1, keepdims=True)
    sigma = jnp.mean((x - mu) ** 2, axis=-1, keepdims=True)
    return (x - mu) / jnp.sqrt(sigma + _EPS) * weight + bias


if __name__ == "__main__":
    key = jax.random.PRNGKey(0)
    kx, kw, kb, kx2 = jax.random.split(key, 4)

    # Restormer-style usage: (B, H*W, C) tokens with small channel dim (C=32
    # exercises the lane-packed path: G=4 rows folded per 128-lane vreg row).
    B, S, C = 2, 64, 32
    x = jax.random.normal(kx, (B, S, C), dtype=jnp.float32)
    weight = 1.0 + 0.1 * jax.random.normal(kw, (C,), dtype=jnp.float32)
    bias = 0.1 * jax.random.normal(kb, (C,), dtype=jnp.float32)

    out = jax.block_until_ready(withbias_layernorm(x, weight, bias))
    ref = _reference(x, weight, bias)
    assert out.shape == x.shape
    assert jnp.allclose(out, ref, atol=1e-5, rtol=1e-5), "packed-path mismatch"

    # Second small shape exercising the plain (C >= 128) path + ragged-free grid.
    B2, S2, C2 = 2, 8, 256
    x2 = jax.random.normal(kx2, (B2, S2, C2), dtype=jnp.float32)
    w2 = jnp.ones((C2,), dtype=jnp.float32)   # matches nn.Parameter(torch.ones)
    b2 = jnp.zeros((C2,), dtype=jnp.float32)  # matches nn.Parameter(torch.zeros)
    out2 = jax.block_until_ready(withbias_layernorm(x2, w2, b2))
    ref2 = _reference(x2, w2, b2)
    assert out2.shape == x2.shape
    assert jnp.allclose(out2, ref2, atol=1e-5, rtol=1e-5), "plain-path mismatch"

    print("KERNEL_OK")
</pallas_src>

<mosaic_0001>
module attributes {stable_mosaic.version = 11 : i64} {
  func.func @_layernorm_packed_kernel(%arg0: i32, %arg1: memref<16x128xf32, #tpu.memory_space<vmem>>, %arg2: memref<1x128xf32, #tpu.memory_space<vmem>>, %arg3: memref<1x128xf32, #tpu.memory_space<vmem>>, %arg4: memref<128x128xf32, #tpu.memory_space<vmem>>, %arg5: memref<16x128xf32, #tpu.memory_space<vmem>>) attributes {dimension_semantics = [#tpu.dimension_semantics<parallel>], iteration_bounds = array<i64: 2>, scalar_prefetch = 0 : i64, scratch_operands = 0 : i64, tpu.core_type = #tpu.core_type<tc>, window_params = [{transform_indices = @transform_0, window_bounds = array<i64: 16, 128>}, {pipeline_mode = #tpu.pipeline_mode<synchronous>, transform_indices = @transform_1, window_bounds = array<i64: 1, 128>}, {pipeline_mode = #tpu.pipeline_mode<synchronous>, transform_indices = @transform_2, window_bounds = array<i64: 1, 128>}, {pipeline_mode = #tpu.pipeline_mode<synchronous>, transform_indices = @transform_3, window_bounds = array<i64: 128, 128>}, {transform_indices = @transform_4, window_bounds = array<i64: 16, 128>}]} {
    %c0 = arith.constant 0 : index
    %c0_0 = arith.constant 0 : index
    %0 = vector.load %arg1[%c0, %c0_0] : memref<16x128xf32, #tpu.memory_space<vmem>>, vector<16x128xf32>
    %c0_1 = arith.constant 0 : index
    %c0_2 = arith.constant 0 : index
    %1 = vector.load %arg4[%c0_1, %c0_2] : memref<128x128xf32, #tpu.memory_space<vmem>>, vector<128x128xf32>
    %cst = arith.constant dense<0.000000e+00> : vector<16x128xf32>
    %2 = tpu.matmul %0, %1, %cst {dimension_numbers = #tpu.dot_dimension_numbers<[1], [0], [0], [1], [0, 0, 1, 1], [], []>, precision = #tpu.contract_precision<fp32>} : vector<16x128xf32>, vector<128x128xf32>, vector<16x128xf32> -> vector<16x128xf32>
    %cst_3 = arith.constant 3.125000e-02 : f32
    %3 = vector.broadcast %cst_3 : f32 to vector<16x128xf32>
    %4 = arith.mulf %2, %3 : vector<16x128xf32>
    %5 = arith.subf %0, %4 : vector<16x128xf32>
    %6 = arith.mulf %5, %5 : vector<16x128xf32>
    %cst_4 = arith.constant dense<0.000000e+00> : vector<16x128xf32>
    %7 = tpu.matmul %6, %1, %cst_4 {dimension_numbers = #tpu.dot_dimension_numbers<[1], [0], [0], [1], [0, 0, 1, 1], [], []>, precision = #tpu.contract_precision<fp32>} : vector<16x128xf32>, vector<128x128xf32>, vector<16x128xf32> -> vector<16x128xf32>
    %cst_5 = arith.constant 3.125000e-02 : f32
    %8 = vector.broadcast %cst_5 : f32 to vector<16x128xf32>
    %9 = arith.mulf %7, %8 : vector<16x128xf32>
    %cst_6 = arith.constant 9.99999974E-6 : f32
    %10 = vector.broadcast %cst_6 : f32 to vector<16x128xf32>
    %11 = arith.addf %9, %10 : vector<16x128xf32>
    %12 = math.rsqrt %11 : vector<16x128xf32>
    %13 = arith.mulf %5, %12 : vector<16x128xf32>
    %c0_7 = arith.constant 0 : index
    %c0_8 = arith.constant 0 : index
    %14 = vector.load %arg2[%c0_7, %c0_8] : memref<1x128xf32, #tpu.memory_space<vmem>>, vector<1x128xf32>
    %15 = vector.broadcast %14 : vector<1x128xf32> to vector<16x128xf32>
    %16 = arith.mulf %13, %15 : vector<16x128xf32>
    %c0_9 = arith.constant 0 : index
    %c0_10 = arith.constant 0 : index
    %17 = vector.load %arg3[%c0_9, %c0_10] : memref<1x128xf32, #tpu.memory_space<vmem>>, vector<1x128xf32>
    %18 = vector.broadcast %17 : vector<1x128xf32> to vector<16x128xf32>
    %19 = arith.addf %16, %18 : vector<16x128xf32>
    %c0_11 = arith.constant 0 : index
    %c0_12 = arith.constant 0 : index
    %20 = vector.load %arg5[%c0_11, %c0_12] : memref<16x128xf32, #tpu.memory_space<vmem>>, vector<16x128xf32>
    tpu.vector_store %arg5[%c0_11, %c0_12], %19 {strides = array<i32>} : memref<16x128xf32, #tpu.memory_space<vmem>>, vector<16x128xf32>,
    return
  }
  func.func @transform_0(%arg0: i32) -> (i32, i32) {
    %c0_i32 = arith.constant 0 : i32
    %c0_i32_0 = arith.constant 0 : i32
    return %arg0, %c0_i32 : i32, i32
  }
  func.func @transform_1(%arg0: i32) -> (i32, i32) {
    %c0_i32 = arith.constant 0 : i32
    %c0_i32_0 = arith.constant 0 : i32
    %c0_i32_1 = arith.constant 0 : i32
    return %c0_i32, %c0_i32_0 : i32, i32
  }
  func.func @transform_2(%arg0: i32) -> (i32, i32) {
    %c0_i32 = arith.constant 0 : i32
    %c0_i32_0 = arith.constant 0 : i32
    %c0_i32_1 = arith.constant 0 : i32
    return %c0_i32, %c0_i32_0 : i32, i32
  }
  func.func @transform_3(%arg0: i32) -> (i32, i32) {
    %c0_i32 = arith.constant 0 : i32
    %c0_i32_0 = arith.constant 0 : i32
    %c0_i32_1 = arith.constant 0 : i32
    return %c0_i32, %c0_i32_0 : i32, i32
  }
  func.func @transform_4(%arg0: i32) -> (i32, i32) {
    %c0_i32 = arith.constant 0 : i32
    %c0_i32_0 = arith.constant 0 : i32
    return %arg0, %c0_i32 : i32, i32
  }
}

</mosaic_0001>

<bundles_post_ra>
// kernel: tpu_custom_call.1
= control target key start
LH: loop header
LB: loop body
LE: loop exit
PB: predicated region body
PF: predicated region fallthrough
CT: control target
= control target key end

     0   :  { %9 = vsyncpa [#allocation3], 0  ;;  %s3471_s0 = inlined_call_operand.hbm [shape: f32[32,128], index: 0, kind: input, shape index: {}]   ;;  %s3472_s1 = inlined_call_operand.vmem [shape: f32[1,128], index: 1, kind: input, shape index: {}]   ;;  %s3473_s2 = inlined_call_operand.vmem [shape: f32[1,128], index: 2, kind: input, shape index: {}]   ;;  %s3474_s3 = inlined_call_operand.hbm [shape: f32[128,128], index: 3, kind: input, shape index: {}]   ;;  %s3475_s4 = inlined_call_operand.hbm [shape: f32[32,128], index: 4, kind: output, shape index: {}]  }
   0x1   :  { %11 = vsyncpa [#allocation3 + $0x1], 0 }
   0x2   :  { %12 = vsyncpa [#allocation6], 0 }
   0x3   :  { %13 = vsyncpa [#allocation4], 0 }
   0x4   :  { %15 = vsyncpa [#allocation4 + $0x1], 0  ;;  %s2627_s15 = smov 0   ;;  %s2629_s16 = smov 0  }
   0x5   :  { %s2631_s17 = smov 0   ;;  %s2633_s18 = smov 0  }
   0x6 LB: > { %s2648_s19 = sadd.s32 4294967295, %s2593_s18   ;;  %s1750_s20 = sadd.s32 4294967294, %s2593_s18   ;;  %s2593_s18 = sphi %s2633_s18, %s3583_s18   ;;  %s2589_s17 = sphi %s2631_s17, %s3582_s17   ;;  %s2585_s16 = sphi %s2629_s16, %s3581_s16   ;;  %s2581_s15 = sphi %s2627_s15, %s3580_s15  }
   0x7   : > { %p41_p0 = scmp.ne.s32.totalorder %s2585_s16, %s2581_s15  ;;  %p3476_p1 = scmp.eq.s32.totalorder %s2648_s19, 0 }
   0x8   : > { %p134_p3 = scmp.eq.s32.totalorder %s1750_s20, 1  ;;  %p1751_p5 = scmp.ge.s32.totalorder %s2593_s18, 1 }
   0x9   : > { %p2657_p4 = por %p3476_p1, %p41_p0  ;;  %p141_p7 = scmp.lt.s32.totalorder %s2593_s18, 3 }
   0xa   : > { %p2662_p6 = por %p134_p3, %p41_p0  ;;  %s2595_s24 = smov [#allocation5]  }
   0xb   : > { %s3520_s21 = scalar_select %p2657_p4, 1, 0 }
   0xc   : > { %s3521_s22 = scalar_select %p2662_p6, 1, 0 }
   0xd   : > { %p2667_p8 = pnand %p1751_p5, %p141_p7  ;;  %s159_s25 = sshll.u32 %s2595_s24, 4  ;;  %s160_s25 = int_to_ptr.vmem [resolvable:$true] %s159_s25 }
   0xe   : > { %s2681_s27 = sadd.s32 1, %s2593_s18   ;;  %s28_s28 = sadd.s32 1, %s2589_s17 }
   0xf   : > { %s3522_s23 = scalar_select %p2667_p8, 1, 0 }
  0x10   : > { %p2414_p9 = pneg %p2667_p8  ;;  %s25_s29 = ssub.s32 %s2593_s18, %s2681_s27 }
  0x11   : > { %s2482_s30 = scalar_lea.vmem %s160_s25, 2048  ;;  %p2490_p5 = scmp.lt.s32.totalorder %s160_s25, %s160_s25 }
  0x12   : > { %p2676_p11 = pnand %p2414_p9, %p3476_p1  ;;  %p2483_p13 = scmp.ne.s32.totalorder %s160_s25, %s2482_s30 }
  0x13   : > { %p2491_p7 = scmp.lt.s32.totalorder %s2482_s30, %s2482_s30 }
  0x14   : > { %p2473_p12 = pneg %p2676_p11 }
  0x15   : > { %p2492_p10 = por %p2491_p7, %p2490_p5 }
  0x16   : > { %p2485_p0 = pnand %p2483_p13, %p2473_p12 }
  0x18   : > { %p2486_p3 = pneg %p2485_p0 }
  0x1a   : > { %p2493_p2 = pnand %p2492_p10, %p2486_p3 }
  0x1c   : > { %2496 = shalt.err (!%p2493_p2)
}
  0x1d   : > { %s2596_s5 = smov 128   ;;  %s2597_s6 = smov 8  }
  0x1e   : > { %2417 = dma.hbm_to_vmem [thread:$0]  (!%p2676_p11), %s3474_s3, 2048, %s160_s25, [#allocation6], %s2596_s5, %s2596_s5, %s2597_s6  }
  0x1f   : > { %p26_p2 = scmp.eq.s32.totalorder %s25_s29, 0  ;;  %p35_p9 = scmp.ne.s32.totalorder %s2589_s17, %s2585_s16 }
  0x20   : > { %p36_p10 = scmp.eq.s32.totalorder %s2593_s18, 0  ;;  %p2427_p12 = scmp.lt.s32.totalorder %s2593_s18, 2 }
  0x21   : > { %s2701_s9 = scalar_select %p26_p2, %s2589_s17, %s28_s28  }
  0x22   : > { %p37_p13 = por %p36_p10, %p35_p9  ;;  %p3524_p0 = scmp.eq.s32.totalorder %s2648_s19, 1 }
  0x23   : > { %s173_s11 = sand.u32 1, %s2589_s17   ;;  %s1768_s12 = sshll.u32 %s2593_s18, 8 }
  0x24   : > { %p2705_p3 = por %p3524_p0, %p35_p9  ;;  %s1754_s13 = sshll.u32 %s173_s11, 4 }
  0x25   : > { %s2714_s24 = scalar_lea.hbm %s3471_s0, %s1768_s12  ;;  %s177_s25 = scalar_lea.vmem [#allocation2], %s1754_s13 }
  0x26   : > { %s3525_s10 = scalar_select %p2705_p3, 1, 0 }
  0x27   : > { %s184_s26 = sshll.u32 %s177_s25, 4  ;;  %p2716_p11 = pnand %p2427_p12, %p37_p13  ;;  %s2720_s26 = int_to_ptr.vmem [resolvable:$true] %s184_s26 }
  0x28   : > { %s2722_s29 = scalar_lea.sflag [#allocation3], %s173_s11  ;;  %s2497_s30 = scalar_lea.hbm %s2714_s24, 256 }
  0x29   : > { %p2498_p5 = scmp.ne.s32.totalorder %s2714_s24, %s2497_s30  ;;  %p2499_p7 = pneg %p2716_p11 }
  0x2a   : > { %s2502_s12 = scalar_lea.hbm %s3471_s0, 512  ;;  %p2503_p10 = scmp.lt.s32.totalorder %s2714_s24, %s3471_s0 }
  0x2b   : > { %p2500_p2 = pnand %p2499_p7, %p2498_p5  ;;  %p2504_p12 = scmp.lt.s32.totalorder %s2502_s12, %s2497_s30 }
  0x2d   : > { %p2501_p9 = pneg %p2500_p2  ;;  %p2505_p13 = por %p2504_p12, %p2503_p10 }
  0x2f   : > { %p2506_p0 = pnand %p2505_p13, %p2501_p9 }
  0x31   : > { %2509 = shalt.err (!%p2506_p0)
}
  0x32   : > { %s2510_s11 = scalar_lea.vmem %s2720_s26, 256  ;;  %s2598_s20 = smov [#allocation2]  }
  0x33   : > { %p2511_p1 = scmp.ne.s32.totalorder %s2720_s26, %s2510_s11  ;;  %s2515_s25 = sshll.u32 %s2598_s20, 4  ;;  %s2516_s25 = int_to_ptr.vmem [resolvable:$false] %s2515_s25 }
  0x34   : > { %s2517_s7 = scalar_lea.vmem %s2516_s25, 512  ;;  %p2518_p2 = scmp.lt.s32.totalorder %s2720_s26, %s2516_s25 }
  0x35   : > { %p2513_p6 = pnand %p2511_p1, %p2499_p7  ;;  %p2519_p3 = scmp.lt.s32.totalorder %s2517_s7, %s2510_s11 }
  0x37   : > { %p2514_p5 = pneg %p2513_p6  ;;  %p2520_p4 = por %p2519_p3, %p2518_p2 }
  0x39   : > { %p2521_p8 = pnand %p2520_p4, %p2514_p5 }
  0x3b   : > { %2524 = shalt.err (!%p2521_p8)
}
  0x3c   : > { %2421 = dma.hbm_to_vmem [thread:$0]  (!%p2716_p11), %s2714_s24, 256, %s2720_s26, %s2722_s29, %s2596_s5, %s2596_s5, %s2597_s6  }
  0x3d   : > { %p3527_p1 = scmp.ne.s32.totalorder %s3522_s23, 0 }
  0x3f   : > { %196 = sbr.rel (%p3527_p1) target bundleno = 704 (0x2c0), region = 36 }
  0x44   : > { %s2749_s30 = sand.u32 1, %s2585_s16   ;;  %p3528_p4 = scmp.ne.s32.totalorder %s3520_s21, 0 }
  0x45   : > { %s1758_s8 = sshll.u32 %s2749_s30, 4  ;;  %s199_s12 = scalar_lea.sflag [#allocation3], %s2749_s30 }
  0x46   : > { %s2755_s28 = scalar_lea.vmem [#allocation2], %s1758_s8 }
  0x47   : > { %2568 = dma.done.wait (%p3528_p4), %s199_s12, 256  }
  0x48   : > { %2570 = vsyncadd (%p3528_p4), %s199_s12, 4294967040  ;;  %p3529_p6 = scmp.eq.s32.totalorder %s2648_s19, 0 }
  0x4a   : > { %2572 = dma.done.wait (%p3529_p6), [#allocation6], 2048   ;;  %p3530_p8 = pmov %p3529_p6 }
  0x4b   : > { %v250_v0 = vld [vmem:[#allocation5 + $0x78] sm:$0xff]  ;;  %v249_v1 = vld [vmem:[#allocation5 + $0x70] sm:$0xff]  ;;  %v248_v2 = vld [vmem:[#allocation5 + $0x68] sm:$0xff]  ;;  %s1769_s24 = sshll.u32 %s2648_s19, 8  ;;  %s230_s26 = scalar_lea.vmem [#allocation7], %s1758_s8 }
  0x4c   : > { %2574 = vsyncadd (%p3530_p8), [#allocation6], 4294965248  ;;  %v2765_v3 = vand.u32 4294901760, %v250_v0  ;;  %v2767_v4 = vand.u32 4294901760, %v249_v1  ;;  %v2769_v5 = vand.u32 4294901760, %v248_v2  ;;  %v247_v6 = vld [vmem:[#allocation5 + $0x60] sm:$0xff]  ;;  %s3426_s11 = scalar_lea.hbm %s3475_s4, %s1769_s24 }
  0x4d   : > { %v246_v7 = vld [vmem:[#allocation5 + $0x58] sm:$0xff]  ;;  %v245_v8 = vld [vmem:[#allocation5 + $0x50] sm:$0xff]  ;;  %v2771_v9 = vand.u32 4294901760, %v247_v6  ;;  %v244_v12 = vld [vmem:[#allocation5 + $0x48] sm:$0xff]  ;;  %s1667_s29 = sshll.u32 %s230_s26, 4  ;;  %s1654_s20 = scalar_lea.sflag [#allocation4], %s2749_s30  ;;  %s3428_s29 = int_to_ptr.vmem [resolvable:$true] %s1667_s29 }
  0x4e   : > { %v2773_v10 = vand.u32 4294901760, %v246_v7  ;;  %v2775_v11 = vand.u32 4294901760, %v245_v8  ;;  %v243_v13 = vld [vmem:[#allocation5 + $0x40] sm:$0xff]  ;;  %1986 = vmatprep.subr.mxu0 %v2765_v3  ;;  %v2779_v14 = vsub.f32 %v250_v0, %v2765_v3  ;;  %v2782_v15 = vsub.f32 %v249_v1, %v2767_v4  ;;  %v242_v18 = vld [vmem:[#allocation5 + $0x38] sm:$0xff]  ;;  %v241_v25 = vld [vmem:[#allocation5 + $0x30] sm:$0xff]  ;;  %s2525_s19 = scalar_lea.vmem %s3428_s29, 256 }
  0x4f   : > { %v2784_v16 = vand.u32 4294901760, %v244_v12  ;;  %v2787_v17 = vsub.f32 %v248_v2, %v2769_v5  ;;  %1987 = vmatpush3.msra.mxu0 %v2765_v3  ;;  %v2791_v19 = vsub.f32 %v247_v6, %v2771_v9  ;;  %v2806_v24 = vand.u32 4294901760, %v243_v13  ;;  %v240_v35 = vld [vmem:[#allocation5 + $0x28] sm:$0xff]  ;;  %v239_v40 = vld [vmem:[#allocation5 + $0x20] sm:$0xff]  ;;  %v238_v48 = vld [vmem:[#allocation5 + $0x18] sm:$0xff]  ;;  %p2526_p3 = scmp.ne.s32.totalorder %s3428_s29, %s2525_s19  ;;  %p3577_p11 = scmp.ne.s32.totalorder %s3525_s10, 0 }
  0x50   : > { %v2794_v20 = vsub.f32 %v246_v7, %v2773_v10  ;;  %1988 = vmatprep.subr.mxu0 %v2767_v4  ;;  %v2798_v21 = vand.u32 4294901760, %v2779_v14  ;;  %v2801_v22 = vand.u32 4294901760, %v2782_v15  ;;  %v2812_v27 = vand.u32 4294901760, %v242_v18  ;;  %v2866_v49 = vld [vmem:[%s2755_s28] sm:$0xff]  ;;  %v2881_v54 = vld [vmem:[%s2755_s28 + $0x8] sm:$0xff]  ;;  %s2599_s25 = smov [#allocation7]  }
  0x51   : > { %v2804_v23 = vand.u32 4294901760, %v2787_v17  ;;  %1989 = vmatpush3.msra.mxu0 %v2767_v4  ;;  %v2810_v26 = vand.u32 4294901760, %v2791_v19  ;;  %v2818_v29 = vsub.f32 %v245_v8, %v2775_v11  ;;  %v2828_v33 = vsub.f32 %v244_v12, %v2784_v16  ;;  %3534 = vst [vmem:[#allocation14_spill] sm:$0xff] %v2866_v49  ;;  %3537 = vst [vmem:[#allocation17_spill] sm:$0xff] %v2881_v54  ;;  %v237_v59 = vld [vmem:[#allocation5 + $0x10] sm:$0xff]  ;;  %v236_v2 = vld [vmem:[#allocation5 + $0x8] sm:$0xff]  ;;  %p2527_p7 = pnand %p2526_p3, %p3577_p11 }
  0x52   : > { %v2815_v28 = vand.u32 4294901760, %v2794_v20  ;;  %1990 = vmatprep.subr.mxu0 %v2769_v5  ;;  %v356_v30 = vsub.f32 %v2779_v14, %v2798_v21  ;;  %v363_v31 = vsub.f32 %v2782_v15, %v2801_v22  ;;  %v2831_v34 = vand.u32 4294901760, %v241_v25  ;;  %s2529_s7 = sshll.u32 %s2599_s25, 4  ;;  %s2530_s7 = int_to_ptr.vmem [resolvable:$false] %s2529_s7 }
  0x53   : > { %v370_v32 = vsub.f32 %v2787_v17, %v2804_v23  ;;  %1991 = vmatpush3.msra.mxu0 %v2769_v5  ;;  %v377_v38 = vsub.f32 %v2791_v19, %v2810_v26  ;;  %v2841_v39 = vand.u32 4294901760, %v2818_v29  ;;  %v2847_v42 = vand.u32 4294901760, %v2828_v33  ;;  %p2528_p9 = pneg %p2527_p7  ;;  %s2531_s8 = scalar_lea.vmem %s2530_s7, 512 }
  0x54   : > { %1992 = vmatprep.subr.mxu0 %v2771_v9  ;;  %v2834_v36 = vand.u32 4294901760, %v356_v30  ;;  %v2836_v37 = vand.u32 4294901760, %v363_v31  ;;  %v384_v41 = vsub.f32 %v2794_v20, %v2815_v28  ;;  %v2850_v43 = vsub.f32 %v243_v13, %v2806_v24  ;;  %p2532_p10 = scmp.lt.s32.totalorder %s3428_s29, %s2530_s7  ;;  %p2533_p12 = scmp.lt.s32.totalorder %s2531_s8, %s2525_s19 }
  0x55   : > { %1993 = vmatpush3.msra.mxu0 %v2771_v9  ;;  %3532 = vst [vmem:[#allocation12_spill] sm:$0xff] %v2847_v42  ;;  %v2854_v44 = vand.u32 4294901760, %v370_v32  ;;  %v2856_v45 = vand.u32 4294901760, %v240_v35  ;;  %v2859_v46 = vsub.f32 %v242_v18, %v2812_v27  ;;  %v2863_v47 = vand.u32 4294901760, %v239_v40  ;;  %v235_v18 = vld [vmem:[#allocation5] sm:$0xff] }
  0x56   : > { %3531 = vst [vmem:[#allocation11_spill] sm:$0xff] %v2836_v37  ;;  %1994 = vmatprep.subr.mxu0 %v2773_v10  ;;  %2021 = vmatprep.subr.mxu1 %v2834_v36  ;;  %v2870_v50 = vand.u32 4294901760, %v377_v38  ;;  %v391_v51 = vsub.f32 %v2818_v29, %v2841_v39  ;;  %v2875_v52 = vand.u32 4294901760, %v2850_v43  ;;  %v2878_v53 = vsub.f32 %v241_v25, %v2831_v34  ;;  %p2534_p13 = por %p2533_p12, %p2532_p10 }
  0x57   : > { %3533 = vst [vmem:[#allocation13_spill] sm:$0xff] %v2854_v44  ;;  %1995 = vmatpush3.msra.mxu0 %v2773_v10  ;;  %2022 = vmatpush3.msra.mxu1 %v2834_v36  ;;  %v2885_v55 = vand.u32 4294901760, %v384_v41  ;;  %v398_v56 = vsub.f32 %v2828_v33, %v2847_v42  ;;  %v2891_v57 = vand.u32 4294901760, %v238_v48  ;;  %v2894_v58 = vand.u32 4294901760, %v2859_v46 }
  0x58   : > { %1996 = vmatprep.subr.mxu0 %v2775_v11  ;;  %2023 = vmatprep.subr.mxu1 %v2836_v37  ;;  %3535 = vst [vmem:[#allocation15_spill] sm:$0xff] %v2870_v50  ;;  %3536 = vst [vmem:[#allocation16_spill] sm:$0xff] %v2875_v52  ;;  %v2897_v60 = vsub.f32 %v240_v35, %v2856_v45  ;;  %v2900_v61 = vand.u32 4294901760, %v2866_v49  ;;  %v2905_v62 = vand.u32 4294901760, %v2881_v54  ;;  %v2909_v63 = vand.u32 4294901760, %v391_v51  ;;  %p2535_p0 = pnand %p2534_p13, %p2528_p9 }
  0x59   : > { %1997 = vmatpush3.msra.mxu0 %v2775_v11  ;;  %2024 = vmatpush3.msra.mxu1 %v2836_v37  ;;  %3538 = vst [vmem:[#allocation18_spill] sm:$0xff] %v2885_v55  ;;  %3539 = vst [vmem:[#allocation19_spill] sm:$0xff] %v2894_v58  ;;  %v405_v0 = vsub.f32 %v2850_v43, %v2875_v52  ;;  %v2914_v1 = vand.u32 4294901760, %v2878_v53  ;;  %v2917_v6 = vsub.f32 %v239_v40, %v2863_v47 }
  0x5a   : > { %1998 = vmatprep.subr.mxu0 %v2784_v16  ;;  %2025 = vmatprep.subr.mxu1 %v2854_v44  ;;  %3540 = vst [vmem:[#allocation20_spill] sm:$0xff] %v2909_v63  ;;  %v2921_v7 = vand.u32 4294901760, %v398_v56  ;;  %v2923_v8 = vand.u32 4294901760, %v237_v59  ;;  %v412_v12 = vsub.f32 %v2859_v46, %v2894_v58  ;;  %v2930_v13 = vand.u32 4294901760, %v2897_v60 }
  0x5b   : > { %1999 = vmatpush3.msra.mxu0 %v2784_v16  ;;  %2026 = vmatpush3.msra.mxu1 %v2854_v44  ;;  %3541 = vst [vmem:[#allocation21_spill] sm:$0xff] %v2914_v1  ;;  %v2934_v25 = vsub.f32 %v2866_v49, %v2900_v61  ;;  %v2937_v30 = vsub.f32 %v238_v48, %v2891_v57  ;;  %v2941_v31 = vand.u32 4294901760, %v236_v2  ;;  %v2949_v35 = vand.u32 4294901760, %v405_v0 }
  0x5c   : > { %2000 = vmatprep.subr.mxu0 %v2806_v24  ;;  %2027 = vmatprep.subr.mxu1 %v2870_v50  ;;  %3542 = vst [vmem:[#allocation22_spill] sm:$0xff] %v2921_v7  ;;  %3543 = vst [vmem:[#allocation23_spill] sm:$0xff] %v2930_v13  ;;  %v2945_v32 = vsub.f32 %v2881_v54, %v2905_v62  ;;  %v419_v38 = vsub.f32 %v2878_v53, %v2914_v1  ;;  %v2954_v40 = vand.u32 4294901760, %v2917_v6 }
  0x5d   : > { %2001 = vmatpush3.msra.mxu0 %v2806_v24  ;;  %2028 = vmatpush3.msra.mxu1 %v2870_v50  ;;  %3544 = vst [vmem:[#allocation24_spill] sm:$0xff] %v2949_v35  ;;  %v2958_v41 = vand.u32 4294901760, %v235_v18  ;;  %v2961_v48 = vsub.f32 %v237_v59, %v2923_v8  ;;  %v2965_v51 = vand.u32 4294901760, %v412_v12  ;;  %v426_v56 = vsub.f32 %v2897_v60, %v2930_v13 }
  0x5e   : > { %2002 = vmatprep.subr.mxu0 %v2812_v27  ;;  %2029 = vmatprep.subr.mxu1 %v2885_v55  ;;  %3545 = vst [vmem:[#allocation25_spill] sm:$0xff] %v2954_v40  ;;  %v2971_v49 = vand.u32 4294901760, %v2937_v30  ;;  %v2977_v54 = vsub.f32 %v236_v2, %v2941_v31  ;;  %v2981_v12 = vand.u32 4294901760, %v419_v38  ;;  %v433_v0 = vsub.f32 %v2917_v6, %v2954_v40 }
  0x5f   : > { %2003 = vmatpush3.msra.mxu0 %v2812_v27  ;;  %2030 = vmatpush3.msra.mxu1 %v2885_v55  ;;  %3546 = vst [vmem:[#allocation26_spill] sm:$0xff] %v2965_v51  ;;  %v2991_v59 = vsub.f32 %v235_v18, %v2958_v41  ;;  %v2995_v2 = vand.u32 4294901760, %v426_v56  ;;  %v3550_v38 = vand.u32 4294901760, %v2934_v25  ;;  %v3551_v18 = vand.u32 4294901760, %v2945_v32 }
  0x60   : > { %2004 = vmatprep.subr.mxu0 %v2831_v34  ;;  %2031 = vmatprep.subr.mxu1 %v2909_v63  ;;  %3547 = vst [vmem:[#allocation27_spill] sm:$0xff] %v2971_v49  ;;  %3548 = vst [vmem:[#allocation28_spill] sm:$0xff] %v2981_v12  ;;  %v440_v55 = vsub.f32 %v2937_v30, %v2971_v49  ;;  %v3008_v50 = vand.u32 4294901760, %v2977_v54  ;;  %v3012_v56 = vand.u32 4294901760, %v433_v0 }
  0x61   : > { %2005 = vmatpush3.msra.mxu0 %v2831_v34  ;;  %2032 = vmatpush3.msra.mxu1 %v2909_v63  ;;  %v335_v63 = vsub.f32 %v2934_v25, %v3550_v38 }
  0x62   : > { %2006 = vmatprep.subr.mxu0 %v2856_v45  ;;  %2033 = vmatprep.subr.mxu1 %v2921_v7  ;;  %3552 = vst [vmem:[#allocation30_spill] sm:$0xff] %v3008_v50  ;;  %v3023_v44 = vand.u32 4294901760, %v440_v55 }
  0x63   : > { %2007 = vmatpush3.msra.mxu0 %v2856_v45  ;;  %2034 = vmatpush3.msra.mxu1 %v2921_v7  ;;  %v2988_v7 = vand.u32 4294901760, %v2961_v48 }
  0x64   : > { %2008 = vmatprep.subr.mxu0 %v2863_v47  ;;  %2035 = vmatprep.subr.mxu1 %v2949_v35 }
  0x65   : > { %2009 = vmatpush3.msra.mxu0 %v2863_v47  ;;  %2036 = vmatpush3.msra.mxu1 %v2949_v35  ;;  %3549 = vst [vmem:[#allocation29_spill] sm:$0xff] %v2988_v7  ;;  %v345_v35 = vsub.f32 %v2945_v32, %v3551_v18  ;;  %v447_v38 = vsub.f32 %v2961_v48, %v2988_v7  ;;  %v336_v18 = vand.u32 4294901760, %v335_v63 }
  0x66   : > { %2010 = vmatprep.subr.mxu0 %v2891_v57  ;;  %2037 = vmatprep.subr.mxu1 %v2965_v51 }
  0x67   : > { %2011 = vmatpush3.msra.mxu0 %v2891_v57  ;;  %2038 = vmatpush3.msra.mxu1 %v2965_v51  ;;  %v3019_v51 = vand.u32 4294901760, %v2991_v59  ;;  %v346_v0 = vand.u32 4294901760, %v345_v35  ;;  %v3033_v37 = vand.u32 4294901760, %v447_v38  ;;  %v3555_v38 = vand.u32 4294901760, %v2945_v32 }
  0x68   : > { %2012 = vmatprep.subr.mxu0 %v2923_v8  ;;  %2039 = vmatprep.subr.mxu1 %v2981_v12 }
  0x69   : > { %2013 = vmatpush3.msra.mxu0 %v2923_v8  ;;  %2040 = vmatpush3.msra.mxu1 %v2981_v12  ;;  %3553 = vst [vmem:[#allocation31_spill] sm:$0xff] %v3019_v51  ;;  %v454_v12 = vsub.f32 %v2977_v54, %v3008_v50  ;;  %v461_v55 = vsub.f32 %v2991_v59, %v3019_v51 }
  0x6a   : > { %2014 = vmatprep.subr.mxu0 %v2941_v31  ;;  %2041 = vmatprep.subr.mxu1 %v2995_v2 }
  0x6b   : > { %2015 = vmatpush3.msra.mxu0 %v2941_v31  ;;  %2042 = vmatpush3.msra.mxu1 %v2995_v2  ;;  %v3039_v63 = vand.u32 4294901760, %v454_v12  ;;  %v3045_v35 = vand.u32 4294901760, %v461_v55  ;;  %v3554_v12 = vand.u32 4294901760, %v2934_v25  ;;  %v3563_v55 = vld [vmem:[#allocation26_spill] sm:$0xff] }
  0x6c   : > { %2016 = vmatprep.subr.mxu0 %v2958_v41  ;;  %2043 = vmatprep.subr.mxu1 %v3012_v56 }
  0x6d   : > { %2017 = vmatpush3.msra.mxu0 %v2958_v41  ;;  %2044 = vmatpush3.msra.mxu1 %v3012_v56 }
  0x6e   : > { %2018 = vmatprep.mubr.f32.mxu0 %v336_v18  ;;  %2045 = vmatprep.subr.mxu1 %v3023_v44  ;;  %v3561_v18 = vld [vmem:[#allocation22_spill] sm:$0xff] }
  0x6f   : > { %2056 = vmatprep.subr.mxu0 %v2779_v14  ;;  %2019 = vmatmul.mubr.f32.vlgmr.msra.gmra.mxu0 %v346_v0  ;;  %v3562_v0 = vld [vmem:[#allocation24_spill] sm:$0xff] }
  0x70   : > { %2046 = vmatpush3.msra.mxu1 %v3023_v44  ;;  %2057 = vmatpush3.msra.mxu0 %v2779_v14 }
  0x71   : > { %2047 = vmatprep.subr.mxu1 %v3033_v37  ;;  %2058 = vmatprep.subr.mxu0 %v2782_v15 }
  0x72   : > { %2048 = vmatpush3.msra.mxu1 %v3033_v37  ;;  %2059 = vmatpush3.msra.mxu0 %v2782_v15 }
  0x73   : > { %2049 = vmatprep.subr.mxu1 %v3039_v63  ;;  %2060 = vmatprep.subr.mxu0 %v2787_v17 }
  0x74   : > { %2050 = vmatpush3.msra.mxu1 %v3039_v63  ;;  %2061 = vmatpush3.msra.mxu0 %v2787_v17 }
  0x75   : > { %2051 = vmatprep.subr.mxu1 %v3045_v35  ;;  %2062 = vmatprep.subr.mxu0 %v2791_v19 }
  0x76   : > { %2052 = vmatpush3.msra.mxu1 %v3045_v35  ;;  %2053 = vmatprep.mubr.f32.mxu1 %v2900_v61 }
  0x77   : > { %2063 = vmatpush3.msra.mxu0 %v2791_v19  ;;  %2054 = vmatmul.mubr.f32.vlgmr.msra.gmra.mxu1 %v2905_v62 }
  0x78   : > { %2064 = vmatprep.subr.mxu0 %v2794_v20  ;;  %2091 = vmatprep.subr.mxu1 %v2765_v3 }
  0x79   : > { %2065 = vmatpush3.msra.mxu0 %v2794_v20  ;;  %2092 = vmatpush3.msra.mxu1 %v2765_v3 }
  0x7a   : > { %2066 = vmatprep.subr.mxu0 %v2818_v29  ;;  %2093 = vmatprep.subr.mxu1 %v2767_v4 }
  0x7b   : > { %2067 = vmatpush3.msra.mxu0 %v2818_v29  ;;  %2094 = vmatpush3.msra.mxu1 %v2767_v4 }
  0x7c   : > { %2068 = vmatprep.subr.mxu0 %v2828_v33  ;;  %2095 = vmatprep.subr.mxu1 %v2769_v5 }
  0x7d   : > { %2069 = vmatpush3.msra.mxu0 %v2828_v33  ;;  %2096 = vmatpush3.msra.mxu1 %v2769_v5 }
  0x7e   : > { %2070 = vmatprep.subr.mxu0 %v2850_v43  ;;  %2097 = vmatprep.subr.mxu1 %v2771_v9 }
  0x7f   : > { %2071 = vmatpush3.msra.mxu0 %v2850_v43  ;;  %2098 = vmatpush3.msra.mxu1 %v2771_v9 }
  0x80   : > { %2072 = vmatprep.subr.mxu0 %v2859_v46  ;;  %2099 = vmatprep.subr.mxu1 %v2773_v10 }
  0x81   : > { %2073 = vmatpush3.msra.mxu0 %v2859_v46  ;;  %2100 = vmatpush3.msra.mxu1 %v2773_v10 }
  0x82   : > { %2074 = vmatprep.subr.mxu0 %v2878_v53  ;;  %2101 = vmatprep.subr.mxu1 %v2775_v11 }
  0x83   : > { %2075 = vmatpush3.msra.mxu0 %v2878_v53  ;;  %2102 = vmatpush3.msra.mxu1 %v2775_v11 }
  0x84   : > { %2076 = vmatprep.subr.mxu0 %v2897_v60  ;;  %2103 = vmatprep.subr.mxu1 %v2784_v16 }
  0x85   : > { %2077 = vmatpush3.msra.mxu0 %v2897_v60  ;;  %2104 = vmatpush3.msra.mxu1 %v2784_v16 }
  0x86   : > { %2078 = vmatprep.subr.mxu0 %v2917_v6  ;;  %2105 = vmatprep.subr.mxu1 %v2806_v24 }
  0x87   : > { %2079 = vmatpush3.msra.mxu0 %v2917_v6  ;;  %2106 = vmatpush3.msra.mxu1 %v2806_v24 }
  0x88   : > { %2080 = vmatprep.subr.mxu0 %v2937_v30  ;;  %2107 = vmatprep.subr.mxu1 %v2812_v27 }
  0x89   : > { %2081 = vmatpush3.msra.mxu0 %v2937_v30  ;;  %2108 = vmatpush3.msra.mxu1 %v2812_v27 }
  0x8a   : > { %2082 = vmatprep.subr.mxu0 %v2961_v48  ;;  %2109 = vmatprep.subr.mxu1 %v2831_v34 }
  0x8b   : > { %2083 = vmatpush3.msra.mxu0 %v2961_v48  ;;  %2110 = vmatpush3.msra.mxu1 %v2831_v34 }
  0x8c   : > { %2084 = vmatprep.subr.mxu0 %v2977_v54  ;;  %2111 = vmatprep.subr.mxu1 %v2856_v45 }
  0x8d   : > { %2085 = vmatpush3.msra.mxu0 %v2977_v54  ;;  %2112 = vmatpush3.msra.mxu1 %v2856_v45 }
  0x8e   : > { %2086 = vmatprep.subr.mxu0 %v2991_v59  ;;  %2113 = vmatprep.subr.mxu1 %v2863_v47 }
  0x8f   : > { %2087 = vmatpush3.msra.mxu0 %v2991_v59  ;;  %2088 = vmatprep.mubr.f32.mxu0 %v2934_v25  ;;  %v3557_v25 = vld [vmem:[#allocation13_spill] sm:$0xff] }
  0x90   : > { %2114 = vmatpush3.msra.mxu1 %v2863_v47  ;;  %2089 = vmatmul.mubr.f32.vlgmr.msra.gmra.mxu0 %v2945_v32  ;;  %v3560_v32 = vld [vmem:[#allocation20_spill] sm:$0xff] }
  0x91   : > { %2115 = vmatprep.subr.mxu1 %v2891_v57  ;;  %2126 = vmatprep.subr.mxu0 %v2798_v21 }
  0x92   : > { %2116 = vmatpush3.msra.mxu1 %v2891_v57  ;;  %2127 = vmatpush3.msra.mxu0 %v2798_v21 }
  0x93   : > { %2117 = vmatprep.subr.mxu1 %v2923_v8  ;;  %2128 = vmatprep.subr.mxu0 %v2801_v22 }
  0x94   : > { %2118 = vmatpush3.msra.mxu1 %v2923_v8  ;;  %2129 = vmatpush3.msra.mxu0 %v2801_v22 }
  0x95   : > { %2119 = vmatprep.subr.mxu1 %v2941_v31  ;;  %2130 = vmatprep.subr.mxu0 %v2804_v23 }
  0x96   : > { %2120 = vmatpush3.msra.mxu1 %v2941_v31  ;;  %2131 = vmatpush3.msra.mxu0 %v2804_v23 }
  0x97   : > { %2121 = vmatprep.subr.mxu1 %v2958_v41  ;;  %2132 = vmatprep.subr.mxu0 %v2810_v26 }
  0x98   : > { %2122 = vmatpush3.msra.mxu1 %v2958_v41  ;;  %2123 = vmatprep.mubr.f32.mxu1 %v3554_v12  ;;  %v3564_v12 = vld [vmem:[#allocation28_spill] sm:$0xff] }
  0x99   : > { %2133 = vmatpush3.msra.mxu0 %v2810_v26  ;;  %2124 = vmatmul.mubr.f32.vlgmr.msra.gmra.mxu1 %v3555_v38 }
  0x9a   : > { %2134 = vmatprep.subr.mxu0 %v2815_v28  ;;  %2161 = vmatprep.subr.mxu1 %v2765_v3 }
  0x9b   : > { %2135 = vmatpush3.msra.mxu0 %v2815_v28  ;;  %2162 = vmatpush3.msra.mxu1 %v2765_v3 }
  0x9c   : > { %2136 = vmatprep.subr.mxu0 %v2841_v39  ;;  %2163 = vmatprep.subr.mxu1 %v2767_v4 }
  0x9d   : > { %2137 = vmatpush3.msra.mxu0 %v2841_v39  ;;  %2164 = vmatpush3.msra.mxu1 %v2767_v4 }
  0x9e   : > { %2138 = vmatprep.subr.mxu0 %v2847_v42  ;;  %2165 = vmatprep.subr.mxu1 %v2769_v5 }
  0x9f   : > { %2139 = vmatpush3.msra.mxu0 %v2847_v42  ;;  %2166 = vmatpush3.msra.mxu1 %v2769_v5 }
  0xa0   : > { %2140 = vmatprep.subr.mxu0 %v2875_v52  ;;  %2167 = vmatprep.subr.mxu1 %v2771_v9 }
  0xa1   : > { %2141 = vmatpush3.msra.mxu0 %v2875_v52  ;;  %2168 = vmatpush3.msra.mxu1 %v2771_v9 }
  0xa2   : > { %2142 = vmatprep.subr.mxu0 %v2894_v58  ;;  %2169 = vmatprep.subr.mxu1 %v2773_v10 }
  0xa3   : > { %2143 = vmatpush3.msra.mxu0 %v2894_v58  ;;  %2170 = vmatpush3.msra.mxu1 %v2773_v10  ;;  %v3565_v58 = vld [vmem:[#allocation17_spill] sm:$0xff] }
  0xa4   : > { %2144 = vmatprep.subr.mxu0 %v2914_v1  ;;  %2171 = vmatprep.subr.mxu1 %v2775_v11 }
  0xa5   : > { %2145 = vmatpush3.msra.mxu0 %v2914_v1  ;;  %2172 = vmatpush3.msra.mxu1 %v2775_v11 }
  0xa6   : > { %2146 = vmatprep.subr.mxu0 %v2930_v13  ;;  %2173 = vmatprep.subr.mxu1 %v2784_v16 }
  0xa7   : > { %2147 = vmatpush3.msra.mxu0 %v2930_v13  ;;  %2174 = vmatpush3.msra.mxu1 %v2784_v16 }
  0xa8   : > { %2148 = vmatprep.subr.mxu0 %v2954_v40  ;;  %2175 = vmatprep.subr.mxu1 %v2806_v24 }
  0xa9   : > { %2149 = vmatpush3.msra.mxu0 %v2954_v40  ;;  %2176 = vmatpush3.msra.mxu1 %v2806_v24 }
  0xaa   : > { %2150 = vmatprep.subr.mxu0 %v2971_v49  ;;  %2177 = vmatprep.subr.mxu1 %v2812_v27 }
  0xab   : > { %2151 = vmatpush3.msra.mxu0 %v2971_v49  ;;  %2178 = vmatpush3.msra.mxu1 %v2812_v27 }
  0xac   : > { %2152 = vmatprep.subr.mxu0 %v2988_v7  ;;  %2179 = vmatprep.subr.mxu1 %v2831_v34 }
  0xad   : > { %2153 = vmatpush3.msra.mxu0 %v2988_v7  ;;  %2180 = vmatpush3.msra.mxu1 %v2831_v34 }
  0xae   : > { %2154 = vmatprep.subr.mxu0 %v3008_v50  ;;  %2181 = vmatprep.subr.mxu1 %v2856_v45 }
  0xaf   : > { %2155 = vmatpush3.msra.mxu0 %v3008_v50  ;;  %2182 = vmatpush3.msra.mxu1 %v2856_v45 }
  0xb0   : > { %2156 = vmatprep.subr.mxu0 %v3019_v51  ;;  %2183 = vmatprep.subr.mxu1 %v2863_v47 }
  0xb1   : > { %2157 = vmatpush3.msra.mxu0 %v3019_v51  ;;  %2158 = vmatprep.mubr.f32.mxu0 %v2900_v61 }
  0xb2   : > { %2184 = vmatpush3.msra.mxu1 %v2863_v47  ;;  %2159 = vmatmul.mubr.f32.vlgmr.msra.gmra.mxu0 %v2905_v62 }
  0xb3   : > { %2185 = vmatprep.subr.mxu1 %v2891_v57  ;;  %2193 = vmatprep.mubr.f32.mxu1 %v2900_v61  ;;  %v3556_v61 = vld [vmem:[#allocation11_spill] sm:$0xff] }
  0xb4   : > { %2186 = vmatpush3.msra.mxu1 %v2891_v57  ;;  %2196 = vmatprep.subr.mxu0 %v2765_v3 }
  0xb5   : > { %2187 = vmatprep.subr.mxu1 %v2923_v8  ;;  %2197 = vmatpush3.msra.mxu0 %v2765_v3 }
  0xb6   : > { %2188 = vmatpush3.msra.mxu1 %v2923_v8  ;;  %2198 = vmatprep.subr.mxu0 %v2767_v4 }
  0xb7   : > { %2189 = vmatprep.subr.mxu1 %v2941_v31  ;;  %2199 = vmatpush3.msra.mxu0 %v2767_v4 }
  0xb8   : > { %2190 = vmatpush3.msra.mxu1 %v2941_v31  ;;  %2200 = vmatprep.subr.mxu0 %v2769_v5 }
  0xb9   : > { %2191 = vmatprep.subr.mxu1 %v2958_v41  ;;  %2201 = vmatpush3.msra.mxu0 %v2769_v5 }
  0xba   : > { %2192 = vmatpush3.msra.mxu1 %v2958_v41  ;;  %2202 = vmatprep.subr.mxu0 %v2771_v9 }
  0xbb   : > { %2194 = vmatmul.mubr.f32.vlgmr.msra.gmra.mxu1 %v2905_v62  ;;  %2231 = vmatprep.subr.mxu1 %v2834_v36  ;;  %v3558_v62 = vld [vmem:[#allocation15_spill] sm:$0xff] }
  0xbc   : > { %2232 = vmatpush3.msra.mxu1 %v2834_v36  ;;  %2203 = vmatpush3.msra.mxu0 %v2771_v9  ;;  %v3559_v36 = vld [vmem:[#allocation18_spill] sm:$0xff] }
  0xbd   : > { %2233 = vmatprep.subr.mxu1 %v3556_v61  ;;  %2204 = vmatprep.subr.mxu0 %v2773_v10 }
  0xbe   : > { %2234 = vmatpush3.msra.mxu1 %v3556_v61  ;;  %2205 = vmatpush3.msra.mxu0 %v2773_v10 }
  0xbf   : > { %2235 = vmatprep.subr.mxu1 %v3557_v25  ;;  %2206 = vmatprep.subr.mxu0 %v2775_v11 }
  0xc0   : > { %2236 = vmatpush3.msra.mxu1 %v3557_v25  ;;  %2207 = vmatpush3.msra.mxu0 %v2775_v11 }
  0xc1   : > { %2237 = vmatprep.subr.mxu1 %v3558_v62  ;;  %2208 = vmatprep.subr.mxu0 %v2784_v16 }
  0xc2   : > { %2238 = vmatpush3.msra.mxu1 %v3558_v62  ;;  %2209 = vmatpush3.msra.mxu0 %v2784_v16 }
  0xc3   : > { %2239 = vmatprep.subr.mxu1 %v3559_v36  ;;  %2210 = vmatprep.subr.mxu0 %v2806_v24 }
  0xc4   : > { %2240 = vmatpush3.msra.mxu1 %v3559_v36  ;;  %2211 = vmatpush3.msra.mxu0 %v2806_v24 }
  0xc5   : > { %2241 = vmatprep.subr.mxu1 %v3560_v32  ;;  %2212 = vmatprep.subr.mxu0 %v2812_v27 }
  0xc6   : > { %2242 = vmatpush3.msra.mxu1 %v3560_v32  ;;  %2213 = vmatpush3.msra.mxu0 %v2812_v27 }
  0xc7   : > { %2243 = vmatprep.subr.mxu1 %v3561_v18  ;;  %2214 = vmatprep.subr.mxu0 %v2831_v34 }
  0xc8   : > { %2244 = vmatpush3.msra.mxu1 %v3561_v18  ;;  %2215 = vmatpush3.msra.mxu0 %v2831_v34 }
  0xc9   : > { %2245 = vmatprep.subr.mxu1 %v3562_v0  ;;  %2216 = vmatprep.subr.mxu0 %v2856_v45 }
  0xca   : > { %2246 = vmatpush3.msra.mxu1 %v3562_v0  ;;  %2217 = vmatpush3.msra.mxu0 %v2856_v45 }
  0xcb   : > { %2247 = vmatprep.subr.mxu1 %v3563_v55  ;;  %2218 = vmatprep.subr.mxu0 %v2863_v47 }
  0xcc   : > { %2248 = vmatpush3.msra.mxu1 %v3563_v55  ;;  %2219 = vmatpush3.msra.mxu0 %v2863_v47 }
  0xcd   : > { %2249 = vmatprep.subr.mxu1 %v3564_v12  ;;  %2220 = vmatprep.subr.mxu0 %v2891_v57 }
  0xce   : > { %2250 = vmatpush3.msra.mxu1 %v3564_v12  ;;  %2221 = vmatpush3.msra.mxu0 %v2891_v57 }
  0xcf   : > { %2251 = vmatprep.subr.mxu1 %v2995_v2  ;;  %2222 = vmatprep.subr.mxu0 %v2923_v8 }
  0xd0   : > { %2252 = vmatpush3.msra.mxu1 %v2995_v2  ;;  %2223 = vmatpush3.msra.mxu0 %v2923_v8 }
  0xd1   : > { %2253 = vmatprep.subr.mxu1 %v3012_v56  ;;  %2224 = vmatprep.subr.mxu0 %v2941_v31 }
  0xd2   : > { %2254 = vmatpush3.msra.mxu1 %v3012_v56  ;;  %2225 = vmatpush3.msra.mxu0 %v2941_v31 }
  0xd3   : > { %2255 = vmatprep.subr.mxu1 %v3023_v44  ;;  %2226 = vmatprep.subr.mxu0 %v2958_v41 }
  0xd4   : > { %2256 = vmatpush3.msra.mxu1 %v3023_v44  ;;  %2227 = vmatpush3.msra.mxu0 %v2958_v41 }
  0xd5   : > { %2257 = vmatprep.subr.mxu1 %v3033_v37  ;;  %2266 = vmatprep.subr.mxu0 %v2779_v14 }
  0xd6   : > { %2258 = vmatpush3.msra.mxu1 %v3033_v37 }
  0xd7   : > { %2259 = vmatprep.subr.mxu1 %v3039_v63 }
  0xd8   : > { %2260 = vmatpush3.msra.mxu1 %v3039_v63 }
  0xd9   : > { %2261 = vmatprep.subr.mxu1 %v3045_v35 }
  0xda   : > { %2262 = vmatpush3.msra.mxu1 %v3045_v35 }
  0xdb   : > { %2301 = vmatprep.subr.mxu1 %v2765_v3 }
 0x12f   : > { %v2020_v2 = vpop.f32.mrf.mxu0 }
 0x131   : > { %v338_v44 = vpop.f32.mrf.mxu0 }
 0x137   : > { %v2055_v56 = vpop.f32.mrf.mxu1 }
 0x138   : > { %v506_v36 = vadd.f32 %v2055_v56, %v2020_v2 }
 0x139   : > { %v499_v61 = vpop.f32.mrf.mxu1 }
 0x13a   : > { %v500_v37 = vadd.f32 %v499_v61, %v338_v44  ;;  %v3566_v44 = vld [vmem:[#allocation14_spill] sm:$0xff] }
 0x150   : > { %v2090_v38 = vpop.f32.mrf.mxu0 }
 0x151   : > { %v617_v18 = vadd.f32 %v2090_v38, %v506_v36  ;;  %v1762_v36 = vld [vmem:[%s3473_s2] ss:$0 sm:$0xff] }
 0x152   : > { %v609_v25 = vpop.f32.mrf.mxu0 }
 0x153   : > { %v610_v55 = vadd.f32 %v609_v25, %v500_v37 }
 0x159   : > { %v2125_v62 = vpop.f32.mrf.mxu1 }
 0x15a   : > { %v714_v63 = vadd.f32 %v2125_v62, %v617_v18 }
 0x15b   : > { %v705_v0 = vpop.f32.mrf.mxu1 }
 0x15c   : > { %v706_v51 = vadd.f32 %v705_v0, %v610_v55 }
 0x172   : > { %v2160_v32 = vpop.f32.mrf.mxu0 }
 0x173   : > { %v839_v50 = vadd.f32 %v2160_v32, %v714_v63 }
 0x174   : > { %v832_v12 = vpop.f32.mrf.mxu0 }
 0x175   : > { %v833_v7 = vadd.f32 %v832_v12, %v706_v51 }
 0x17b   : > { %v2195_v35 = vpop.f32.mrf.mxu1 }
 0x17c   : > { %v932_v49 = vadd.f32 %v2195_v35, %v839_v50 }
 0x17d   : > { %v925_v40 = vpop.f32.mrf.mxu1 }
 0x17e   : > { %v936_v13 = vmul.f32 0.03125, %v932_v49  ;;  %v926_v1 = vadd.f32 %v925_v40, %v833_v7 }
 0x180   : > { %v3256_v52 = vsub.f32 %v3565_v58, %v936_v13  ;;  %v935_v42 = vmul.f32 0.03125, %v926_v1 }
 0x182   : > { %v940_v2 = vmul.f32 %v3256_v52, %v3256_v52  ;;  %v3261_v56 = vsub.f32 %v3566_v44, %v935_v42 }
 0x184   : > { %v3263_v38 = vand.u32 4294901760, %v940_v2  ;;  %v939_v61 = vmul.f32 %v3261_v56, %v3261_v56 }
 0x186   : > { %v3268_v50 = vsub.f32 %v940_v2, %v3263_v38  ;;  %v3270_v49 = vand.u32 4294901760, %v939_v61 }
 0x188   : > { %v1023_v58 = vsub.f32 %v939_v61, %v3270_v49  ;;  %2263 = vmatprep.mubr.f32.mxu1 %v3270_v49  ;;  %v1034_v1 = vand.u32 4294901760, %v3268_v50 }
 0x189   : > { %2264 = vmatmul.mubr.f32.vlgmr.msra.gmra.mxu1 %v3263_v38 }
 0x18a   : > { %2302 = vmatpush3.msra.mxu1 %v2765_v3  ;;  %v1024_v42 = vand.u32 4294901760, %v1023_v58  ;;  %v1035_v7 = vsub.f32 %v3268_v50, %v1034_v1 }
 0x18b   : > { %2303 = vmatprep.subr.mxu1 %v2767_v4 }
 0x18c   : > { %2304 = vmatpush3.msra.mxu1 %v2767_v4  ;;  %2333 = vmatprep.mubr.f32.mxu1 %v1024_v42  ;;  %v1025_v13 = vsub.f32 %v1023_v58, %v1024_v42  ;;  %v1036_v51 = vand.u32 4294901760, %v1035_v7 }
 0x18d   : > { %2305 = vmatprep.subr.mxu1 %v2769_v5 }
 0x18e   : > { %2306 = vmatpush3.msra.mxu1 %v2769_v5  ;;  %v1026_v40 = vand.u32 4294901760, %v1025_v13 }
 0x18f   : > { %2307 = vmatprep.subr.mxu1 %v2771_v9 }
 0x190   : > { %2308 = vmatpush3.msra.mxu1 %v2771_v9  ;;  %2228 = vmatprep.mubr.f32.mxu0 %v1026_v40 }
 0x191   : > { %2309 = vmatprep.subr.mxu1 %v2773_v10  ;;  %2229 = vmatmul.mubr.f32.vlgmr.msra.gmra.mxu0 %v1036_v51 }
 0x192   : > { %2267 = vmatpush3.msra.mxu0 %v2779_v14  ;;  %2310 = vmatpush3.msra.mxu1 %v2773_v10  ;;  %v3573_v14 = vld [vmem:[#allocation27_spill] sm:$0xff] }
 0x193   : > { %2268 = vmatprep.subr.mxu0 %v2782_v15  ;;  %2298 = vmatprep.mubr.f32.mxu0 %v1023_v58 }
 0x194   : > { %2311 = vmatprep.subr.mxu1 %v2775_v11  ;;  %2269 = vmatpush3.msra.mxu0 %v2782_v15  ;;  %v3574_v15 = vld [vmem:[#allocation29_spill] sm:$0xff] }
 0x195   : > { %2312 = vmatpush3.msra.mxu1 %v2775_v11  ;;  %2270 = vmatprep.subr.mxu0 %v2787_v17 }
 0x196   : > { %2313 = vmatprep.subr.mxu1 %v2784_v16  ;;  %2271 = vmatpush3.msra.mxu0 %v2787_v17  ;;  %v3576_v17 = vld [vmem:[#allocation31_spill] sm:$0xff] }
 0x197   : > { %2314 = vmatpush3.msra.mxu1 %v2784_v16  ;;  %2272 = vmatprep.subr.mxu0 %v2791_v19 }
 0x198   : > { %2315 = vmatprep.subr.mxu1 %v2806_v24  ;;  %2273 = vmatpush3.msra.mxu0 %v2791_v19 }
 0x199   : > { %2316 = vmatpush3.msra.mxu1 %v2806_v24  ;;  %2274 = vmatprep.subr.mxu0 %v2794_v20 }
 0x19a   : > { %2317 = vmatprep.subr.mxu1 %v2812_v27  ;;  %2275 = vmatpush3.msra.mxu0 %v2794_v20 }
 0x19b   : > { %2318 = vmatpush3.msra.mxu1 %v2812_v27  ;;  %2276 = vmatprep.subr.mxu0 %v2818_v29 }
 0x19c   : > { %2319 = vmatprep.subr.mxu1 %v2831_v34  ;;  %2277 = vmatpush3.msra.mxu0 %v2818_v29 }
 0x19d   : > { %2320 = vmatpush3.msra.mxu1 %v2831_v34  ;;  %2278 = vmatprep.subr.mxu0 %v2828_v33 }
 0x19e   : > { %2321 = vmatprep.subr.mxu1 %v2856_v45  ;;  %2279 = vmatpush3.msra.mxu0 %v2828_v33 }
 0x19f   : > { %2322 = vmatpush3.msra.mxu1 %v2856_v45  ;;  %2280 = vmatprep.subr.mxu0 %v2850_v43 }
 0x1a0   : > { %2323 = vmatprep.subr.mxu1 %v2863_v47  ;;  %2281 = vmatpush3.msra.mxu0 %v2850_v43 }
 0x1a1   : > { %2324 = vmatpush3.msra.mxu1 %v2863_v47  ;;  %2282 = vmatprep.subr.mxu0 %v2859_v46 }
 0x1a2   : > { %2325 = vmatprep.subr.mxu1 %v2891_v57  ;;  %2283 = vmatpush3.msra.mxu0 %v2859_v46 }
 0x1a3   : > { %2326 = vmatpush3.msra.mxu1 %v2891_v57  ;;  %2284 = vmatprep.subr.mxu0 %v2878_v53 }
 0x1a4   : > { %2327 = vmatprep.subr.mxu1 %v2923_v8  ;;  %2285 = vmatpush3.msra.mxu0 %v2878_v53 }
 0x1a5   : > { %2328 = vmatpush3.msra.mxu1 %v2923_v8  ;;  %2286 = vmatprep.subr.mxu0 %v2897_v60 }
 0x1a6   : > { %2329 = vmatprep.subr.mxu1 %v2941_v31  ;;  %2287 = vmatpush3.msra.mxu0 %v2897_v60 }
 0x1a7   : > { %2330 = vmatpush3.msra.mxu1 %v2941_v31  ;;  %2288 = vmatprep.subr.mxu0 %v2917_v6 }
 0x1a8   : > { %2331 = vmatprep.subr.mxu1 %v2958_v41  ;;  %2289 = vmatpush3.msra.mxu0 %v2917_v6 }
 0x1a9   : > { %2332 = vmatpush3.msra.mxu1 %v2958_v41  ;;  %2290 = vmatprep.subr.mxu0 %v2937_v30 }
 0x1aa   : > { %2334 = vmatmul.mubr.f32.vlgmr.msra.gmra.mxu1 %v1034_v1  ;;  %2371 = vmatprep.subr.mxu1 %v2765_v3 }
 0x1ab   : > { %2291 = vmatpush3.msra.mxu0 %v2937_v30  ;;  %2372 = vmatpush3.msra.mxu1 %v2765_v3  ;;  %v3567_v3 = vld [vmem:[#allocation12_spill] sm:$0xff] }
 0x1ac   : > { %2403 = vmatprep.mubr.f32.mxu1 %v3270_v49  ;;  %2292 = vmatprep.subr.mxu0 %v2961_v48 }
 0x1ad   : > { %2373 = vmatprep.subr.mxu1 %v2767_v4  ;;  %2293 = vmatpush3.msra.mxu0 %v2961_v48 }
 0x1ae   : > { %2374 = vmatpush3.msra.mxu1 %v2767_v4  ;;  %2294 = vmatprep.subr.mxu0 %v2977_v54  ;;  %v3568_v4 = vld [vmem:[#allocation16_spill] sm:$0xff] }
 0x1af   : > { %2375 = vmatprep.subr.mxu1 %v2769_v5  ;;  %2295 = vmatpush3.msra.mxu0 %v2977_v54 }
 0x1b0   : > { %2376 = vmatpush3.msra.mxu1 %v2769_v5  ;;  %2296 = vmatprep.subr.mxu0 %v2991_v59  ;;  %v3569_v5 = vld [vmem:[#allocation19_spill] sm:$0xff] }
 0x1b1   : > { %2377 = vmatprep.subr.mxu1 %v2771_v9  ;;  %2297 = vmatpush3.msra.mxu0 %v2991_v59  ;;  %v1761_v59 = vld [vmem:[%s3472_s1] ss:$0 sm:$0xff] }
 0x1b2   : > { %2378 = vmatpush3.msra.mxu1 %v2771_v9  ;;  %2299 = vmatmul.mubr.f32.vlgmr.msra.gmra.mxu0 %v3268_v50  ;;  %v3570_v9 = vld [vmem:[#allocation21_spill] sm:$0xff] }
 0x1b3   : > { %2336 = vmatprep.subr.mxu0 %v2798_v21  ;;  %2379 = vmatprep.subr.mxu1 %v2773_v10 }
 0x1b4   : > { %2337 = vmatpush3.msra.mxu0 %v2798_v21  ;;  %2368 = vmatprep.mubr.f32.mxu0 %v3270_v49 }
 0x1b5   : > { %2380 = vmatpush3.msra.mxu1 %v2773_v10  ;;  %2338 = vmatprep.subr.mxu0 %v2801_v22  ;;  %v3571_v10 = vld [vmem:[#allocation23_spill] sm:$0xff] }
 0x1b6   : > { %2381 = vmatprep.subr.mxu1 %v2775_v11  ;;  %2339 = vmatpush3.msra.mxu0 %v2801_v22 }
 0x1b7   : > { %2382 = vmatpush3.msra.mxu1 %v2775_v11  ;;  %2340 = vmatprep.subr.mxu0 %v2804_v23  ;;  %v3572_v11 = vld [vmem:[#allocation25_spill] sm:$0xff] }
 0x1b8   : > { %2383 = vmatprep.subr.mxu1 %v2784_v16  ;;  %2341 = vmatpush3.msra.mxu0 %v2804_v23 }
 0x1b9   : > { %2384 = vmatpush3.msra.mxu1 %v2784_v16  ;;  %2342 = vmatprep.subr.mxu0 %v2810_v26  ;;  %v3575_v16 = vld [vmem:[#allocation30_spill] sm:$0xff] }
 0x1ba   : > { %2385 = vmatprep.subr.mxu1 %v2806_v24  ;;  %2343 = vmatpush3.msra.mxu0 %v2810_v26 }
 0x1bb   : > { %2386 = vmatpush3.msra.mxu1 %v2806_v24  ;;  %2344 = vmatprep.subr.mxu0 %v2815_v28 }
 0x1bc   : > { %2387 = vmatprep.subr.mxu1 %v2812_v27  ;;  %2345 = vmatpush3.msra.mxu0 %v2815_v28 }
 0x1bd   : > { %2388 = vmatpush3.msra.mxu1 %v2812_v27  ;;  %2346 = vmatprep.subr.mxu0 %v2841_v39 }
 0x1be   : > { %2389 = vmatprep.subr.mxu1 %v2831_v34  ;;  %2347 = vmatpush3.msra.mxu0 %v2841_v39 }
 0x1bf   : > { %2390 = vmatpush3.msra.mxu1 %v2831_v34  ;;  %2348 = vmatprep.subr.mxu0 %v3567_v3 }
 0x1c0   : > { %2391 = vmatprep.subr.mxu1 %v2856_v45  ;;  %2349 = vmatpush3.msra.mxu0 %v3567_v3 }
 0x1c1   : > { %2392 = vmatpush3.msra.mxu1 %v2856_v45  ;;  %2350 = vmatprep.subr.mxu0 %v3568_v4 }
 0x1c2   : > { %2393 = vmatprep.subr.mxu1 %v2863_v47  ;;  %2351 = vmatpush3.msra.mxu0 %v3568_v4 }
 0x1c3   : > { %2394 = vmatpush3.msra.mxu1 %v2863_v47  ;;  %2352 = vmatprep.subr.mxu0 %v3569_v5 }
 0x1c4   : > { %2395 = vmatprep.subr.mxu1 %v2891_v57  ;;  %2353 = vmatpush3.msra.mxu0 %v3569_v5 }
 0x1c5   : > { %2396 = vmatpush3.msra.mxu1 %v2891_v57  ;;  %2354 = vmatprep.subr.mxu0 %v3570_v9 }
 0x1c6   : > { %2397 = vmatprep.subr.mxu1 %v2923_v8  ;;  %2355 = vmatpush3.msra.mxu0 %v3570_v9 }
 0x1c7   : > { %2398 = vmatpush3.msra.mxu1 %v2923_v8  ;;  %2356 = vmatprep.subr.mxu0 %v3571_v10 }
 0x1c8   : > { %2399 = vmatprep.subr.mxu1 %v2941_v31  ;;  %2357 = vmatpush3.msra.mxu0 %v3571_v10 }
 0x1c9   : > { %2400 = vmatpush3.msra.mxu1 %v2941_v31  ;;  %2358 = vmatprep.subr.mxu0 %v3572_v11 }
 0x1ca   : > { %2401 = vmatprep.subr.mxu1 %v2958_v41  ;;  %2359 = vmatpush3.msra.mxu0 %v3572_v11 }
 0x1cb   : > { %2402 = vmatpush3.msra.mxu1 %v2958_v41  ;;  %2360 = vmatprep.subr.mxu0 %v3573_v14 }
 0x1cc   : > { %2404 = vmatmul.mubr.f32.vlgmr.msra.gmra.mxu1 %v3263_v38  ;;  %2361 = vmatpush3.msra.mxu0 %v3573_v14 }
 0x1cd   : > { %2362 = vmatprep.subr.mxu0 %v3574_v15 }
 0x1ce   : > { %2363 = vmatpush3.msra.mxu0 %v3574_v15 }
 0x1cf   : > { %2364 = vmatprep.subr.mxu0 %v3575_v16 }
 0x1d0   : > { %2365 = vmatpush3.msra.mxu0 %v3575_v16 }
 0x1d1   : > { %2366 = vmatprep.subr.mxu0 %v3576_v17 }
 0x1d2   : > { %2367 = vmatpush3.msra.mxu0 %v3576_v17 }
 0x1d3   : > { %2369 = vmatmul.mubr.f32.vlgmr.msra.gmra.mxu0 %v3263_v38 }
 0x249   : > { %v2265_v20 = vpop.f32.mrf.mxu1 }
 0x24b   : > { %v1189_v23 = vpop.f32.mrf.mxu1 }
 0x251   : > { %v2230_v19 = vpop.f32.mrf.mxu0 }
 0x252   : > { %v1196_v24 = vadd.f32 %v2265_v20, %v2230_v19 }
 0x253   : > { %v1028_v21 = vpop.f32.mrf.mxu0 }
 0x254   : > { %v1190_v28 = vadd.f32 %v1189_v23, %v1028_v21 }
 0x26a   : > { %v2335_v26 = vpop.f32.mrf.mxu1 }
 0x26c   : > { %v1395_v34 = vpop.f32.mrf.mxu1 }
 0x272   : > { %v2300_v22 = vpop.f32.mrf.mxu0 }
 0x273   : > { %v1307_v29 = vadd.f32 %v2300_v22, %v1196_v24 }
 0x274   : > { %v1299_v27 = vpop.f32.mrf.mxu0 }
 0x275   : > { %v1300_v33 = vadd.f32 %v1299_v27, %v1190_v28  ;;  %v1404_v39 = vadd.f32 %v2335_v26, %v1307_v29 }
 0x277   : > { %v1396_v47 = vadd.f32 %v1395_v34, %v1300_v33 }
 0x28c   : > { %v2405_v43 = vpop.f32.mrf.mxu1 }
 0x28e   : > { %v1615_v60 = vpop.f32.mrf.mxu1 }
 0x293   : > { %v2370_v45 = vpop.f32.mrf.mxu0 }
 0x294   : > { %v1529_v46 = vadd.f32 %v2370_v45, %v1404_v39 }
 0x295   : > { %v1522_v53 = vpop.f32.mrf.mxu0 }
 0x296   : > { %v1622_v54 = vadd.f32 %v2405_v43, %v1529_v46  ;;  %v1523_v57 = vadd.f32 %v1522_v53, %v1396_v47 }
 0x298   : > { %v1626_v6 = vmul.f32 0.03125, %v1622_v54  ;;  %v1616_v8 = vadd.f32 %v1615_v60, %v1523_v57 }
 0x29a   : > { %v1628_v30 = vadd.f32 1e-05, %v1626_v6  ;;  %v1625_v31 = vmul.f32 0.03125, %v1616_v8 }
 0x29c   : > { %2467 = vrsqrt.f32 %v1628_v30  ;;  %v1627_v41 = vadd.f32 1e-05, %v1625_v31 }
 0x29e   : > { %2469 = vrsqrt.f32 %v1627_v41 }
 0x2a9   : > { %v2468_v48 = vpop.eup %2467 }
 0x2aa   : > { %v1632_v25 = vmul.f32 %v2468_v48, %v3256_v52 }
 0x2ab   : > { %v2470_v62 = vpop.eup %2469 }
 0x2ac   : > { %v1641_v32 = vmul.f32 %v1761_v59, %v1632_v25  ;;  %v1631_v37 = vmul.f32 %v2470_v62, %v3261_v56 }
 0x2ae   : > { %v1640_v18 = vmul.f32 %v1761_v59, %v1631_v37  ;;  %v1650_v0 = vadd.f32 %v1762_v36, %v1641_v32 }
 0x2b0   : > { %v1649_v52 = vadd.f32 %v1762_v36, %v1640_v18  ;;  %1652 = vst [vmem:[%s230_s26 + $0x8] sm:$0xff] %v1650_v0 }
 0x2b2   : > { %1651 = vst [vmem:[%s230_s26] sm:$0xff] %v1649_v52 }
 0x2b3   : > { %2538 = shalt.err (!%p2535_p0)
}
 0x2b4   : > { %s2539_s12 = scalar_lea.hbm %s3426_s11, 256  ;;  %s2543_s23 = scalar_lea.hbm %s3475_s4, 512 }
 0x2b5   : > { %p2540_p5 = scmp.ne.s32.totalorder %s3426_s11, %s2539_s12  ;;  %p2544_p4 = scmp.lt.s32.totalorder %s3426_s11, %s3475_s4 }
 0x2b6   : > { %p2545_p6 = scmp.lt.s32.totalorder %s2543_s23, %s2539_s12 }
 0x2b7   : > { %p2541_p2 = pnand %p2540_p5, %p3577_p11 }
 0x2b8   : > { %p2546_p8 = por %p2545_p6, %p2544_p4 }
 0x2b9   : > { %p2542_p1 = pneg %p2541_p2 }
 0x2bb   : > { %p2547_p3 = pnand %p2546_p8, %p2542_p1 }
 0x2bd   : > { %2550 = shalt.err (!%p2547_p3)
}
 0x2be   : > { %s2600_s24 = smov 128   ;;  %s2601_s26 = smov 8  }
 0x2bf   : > { %2412 = dma.vmem_to_hbm [thread:$0]  (%p3577_p11), %s3428_s29, 256, %s3426_s11, %s1654_s20, %s2600_s24, %s2600_s24, %s2601_s26  }
 0x2c0 PF: > { %s1682_s13 = sand.u32 1, %s2581_s15   ;;  %p3578_p7 = scmp.ne.s32.totalorder %s3521_s22, 0 }
 0x2c1   : > { %p3579_p9 = scmp.ge.s32.totalorder %s2593_s18, 2  ;;  %s1683_s14 = scalar_lea.sflag [#allocation4], %s1682_s13 }
 0x2c3   : > { %p2423_p10 = pnand %p3579_p9, %p3578_p7 }
 0x2c5   : > { %p2424_p12 = pneg %p2423_p10 }
 0x2c7   : > { %2576 = dma.done.wait (%p2424_p12), %s1683_s14, 256  }
 0x2c8   : > { %2578 = vsyncadd (%p2424_p12), %s1683_s14, 4294967040  ;;  %p18_p13 = scmp.ge.s32.totalorder %s2681_s27, 4   ;;  %s3580_s15 = smov %s2585_s16 }
 0x2c9   : > { %s3581_s16 = smov %s2589_s17  ;;  %s3582_s17 = smov %s2701_s9 }
 0x2ca   : > { %s3583_s18 = smov %s2681_s27  ;;  %20 = sbr.rel (!%p18_p13) target bundleno = 6 (0x6), region = 85 }
 0x2cf   :  { %1688 = vsyncpa [#allocation3], 1 }
 0x2d0   :  { %1690 = vsyncpa [#allocation3 + $0x1], 1 }
 0x2d1   :  { %1691 = vsyncpa [#allocation6], 1 }
 0x2d2   :  { %1692 = vsyncpa [#allocation4], 1 }
 0x2d3   :  { %1694 = vsyncpa [#allocation4 + $0x1], 1 }

</bundles_post_ra>
